<compile_context>
chip_gen: v6e
topology: v6e:2x2x1
jax: 0.10.0
libtpu: 0.0.40
codegen_flags: <defaults>
</compile_context>

<pallas_src>
import functools

import jax
import jax.numpy as jnp
from jax.experimental import pallas as pl
from jax.experimental.pallas import tpu as pltpu

HIDDEN = 128  # fixed by the module definition


def _round_up(x, m):
    return (x + m - 1) // m * m


def _disc_kernel(x_ref, w1_ref, w2_ref, w3_ref, b_ref, o_ref):
    """One batch tile: 3 MXU matmuls + f32 bias-add / ReLU, all VMEM-resident."""
    x = x_ref[...]                                  # (TM, K)      f32
    w1 = w1_ref[...].astype(jnp.float32)            # (K, 128)     bf16 -> f32
    w2 = w2_ref[...].astype(jnp.float32)            # (128, 128)
    w3 = w3_ref[...].astype(jnp.float32)            # (128, N_pad)
    b = b_ref[...]                                  # (3, N_pad)   f32

    h = jnp.dot(x, w1, preferred_element_type=jnp.float32) + b[0:1, :HIDDEN]
    h = jnp.maximum(h, 0.0)

    h = jnp.dot(h, w2, preferred_element_type=jnp.float32) + b[1:2, :HIDDEN]
    h = jnp.maximum(h, 0.0)

    n_pad = o_ref.shape[-1]
    h = jnp.dot(h, w3, preferred_element_type=jnp.float32) + b[2:3, :n_pad]

    o_ref[...] = h.astype(o_ref.dtype)              # lane-dense (TM, N_pad) store


@functools.partial(jax.jit, static_argnames=())
def discriminator_forward(state, params):
    """Run the DiscriminatorModel trunk on `state` of shape (B, representation_size)."""
    (w1, b1), (w2, b2), (w3, b3) = params
    state = state.astype(jnp.float32)
    B, K = state.shape
    num_envs = w3.shape[1]

    # Lane-dense (padded) output width.
    N_pad = _round_up(max(num_envs, 1), 128)

    # Batch tile: 128 rows for large batches, sublane-aligned tile otherwise.
    TM = 128 if B >= 128 else _round_up(B, 8)
    B_pad = _round_up(B, TM)
    grid = (B_pad // TM,)

    x = state
    if B_pad != B:
        x = jnp.pad(x, ((0, B_pad - B), (0, 0)))

    # bf16 weights in HBM (halves weight DMA bytes); zero-pad final layer lanes.
    w1b = w1.astype(jnp.bfloat16)
    w2b = w2.astype(jnp.bfloat16)
    w3b = jnp.pad(w3, ((0, 0), (0, N_pad - num_envs))).astype(jnp.bfloat16)

    # Pack the three biases into a single f32 array -> one DMA instead of three.
    b_packed = jnp.zeros((3, N_pad), jnp.float32)
    b_packed = b_packed.at[0, :HIDDEN].set(b1.reshape(-1))
    b_packed = b_packed.at[1, :HIDDEN].set(b2.reshape(-1))
    b_packed = b_packed.at[2, :num_envs].set(b3.reshape(-1))

    out = pl.pallas_call(
        _disc_kernel,
        out_shape=jax.ShapeDtypeStruct((B_pad, N_pad), jnp.float32),
        grid=grid,
        in_specs=[
            pl.BlockSpec((TM, K), lambda i: (i, 0)),          # x: tiled on batch
            pl.BlockSpec((K, HIDDEN), lambda i: (0, 0)),      # weights resident
            pl.BlockSpec((HIDDEN, HIDDEN), lambda i: (0, 0)),
            pl.BlockSpec((HIDDEN, N_pad), lambda i: (0, 0)),
            pl.BlockSpec((3, N_pad), lambda i: (0, 0)),       # packed biases
        ],
        out_specs=pl.BlockSpec((TM, N_pad), lambda i: (i, 0)),
        compiler_params=pltpu.CompilerParams(
            dimension_semantics=("parallel",)),               # megacore on v7x
    )(x, w1b, w2b, w3b, b_packed)

    return out[:B, :num_envs]


def init_discriminator_params(key, representation_size, num_envs):
    """Deterministic init mimicking PyTorch nn.Linear default (uniform +/- 1/sqrt(fan_in))."""
    dims = [representation_size, HIDDEN, HIDDEN, num_envs]
    params = []
    for i in range(3):
        fan_in, fan_out = dims[i], dims[i + 1]
        key, kw, kb = jax.random.split(key, 3)
        bound = 1.0 / jnp.sqrt(float(fan_in))
        # stored as (in, out) so the kernel computes x @ W + b (== PyTorch x @ W.T + b)
        w = jax.random.uniform(kw, (fan_in, fan_out), jnp.float32, -bound, bound)
        b = jax.random.uniform(kb, (fan_out,), jnp.float32, -bound, bound)
        params.append((w, b))
    return params


def discriminator_reference(state, params, bf16_weights=True):
    """Pure-JAX reference. With bf16_weights=True it uses the same bf16-rounded
    weight values the kernel streams from HBM (math itself is f32 in both)."""
    h = state.astype(jnp.float32)
    n = len(params)
    for i, (w, b) in enumerate(params):
        wv = w.astype(jnp.bfloat16).astype(jnp.float32) if bf16_weights else w
        h = h @ wv + b
        if i < n - 1:
            h = jnp.maximum(h, 0.0)
    return h


if __name__ == "__main__":
    representation_size = 32
    num_envs = 8
    batch = 16

    key = jax.random.PRNGKey(0)
    key, kx = jax.random.split(key)
    state = jax.random.normal(kx, (batch, representation_size), jnp.float32)

    params = init_discriminator_params(key, representation_size, num_envs)

    out = discriminator_forward(state, params)
    out = jax.block_until_ready(out)

    ref = discriminator_reference(state, params, bf16_weights=True)
    assert out.shape == (batch, num_envs), out.shape
    assert jnp.allclose(out, ref, atol=1e-3, rtol=1e-3), "mismatch vs reference"

    # Looser sanity check against full-f32 weights (PyTorch semantics).
    ref_f32 = discriminator_reference(state, params, bf16_weights=False)
    assert jnp.allclose(out, ref_f32, atol=5e-2, rtol=5e-2), "mismatch vs f32 reference"

    print("KERNEL_OK")
</pallas_src>

<mosaic_0001>
module attributes {stable_mosaic.version = 11 : i64} {
  func.func @_disc_kernel(%arg0: i32, %arg1: memref<16x32xf32, #tpu.memory_space<vmem>>, %arg2: memref<32x128xbf16, #tpu.memory_space<vmem>>, %arg3: memref<128x128xbf16, #tpu.memory_space<vmem>>, %arg4: memref<128x128xbf16, #tpu.memory_space<vmem>>, %arg5: memref<3x128xf32, #tpu.memory_space<vmem>>, %arg6: memref<16x128xf32, #tpu.memory_space<vmem>>) attributes {dimension_semantics = [#tpu.dimension_semantics<parallel>], iteration_bounds = array<i64: 1>, scalar_prefetch = 0 : i64, scratch_operands = 0 : i64, tpu.core_type = #tpu.core_type<tc>, window_params = [{transform_indices = @transform_0, window_bounds = array<i64: 16, 32>}, {pipeline_mode = #tpu.pipeline_mode<synchronous>, transform_indices = @transform_1, window_bounds = array<i64: 32, 128>}, {pipeline_mode = #tpu.pipeline_mode<synchronous>, transform_indices = @transform_2, window_bounds = array<i64: 128, 128>}, {pipeline_mode = #tpu.pipeline_mode<synchronous>, transform_indices = @transform_3, window_bounds = array<i64: 128, 128>}, {pipeline_mode = #tpu.pipeline_mode<synchronous>, transform_indices = @transform_4, window_bounds = array<i64: 3, 128>}, {transform_indices = @transform_5, window_bounds = array<i64: 16, 128>}]} {
    %c0 = arith.constant 0 : index
    %c0_0 = arith.constant 0 : index
    %0 = vector.load %arg1[%c0, %c0_0] : memref<16x32xf32, #tpu.memory_space<vmem>>, vector<16x32xf32>
    %c0_1 = arith.constant 0 : index
    %c0_2 = arith.constant 0 : index
    %1 = vector.load %arg2[%c0_1, %c0_2] : memref<32x128xbf16, #tpu.memory_space<vmem>>, vector<32x128xbf16>
    %2 = arith.extf %1 : vector<32x128xbf16> to vector<32x128xf32>
    %c0_3 = arith.constant 0 : index
    %c0_4 = arith.constant 0 : index
    %3 = vector.load %arg3[%c0_3, %c0_4] : memref<128x128xbf16, #tpu.memory_space<vmem>>, vector<128x128xbf16>
    %4 = arith.extf %3 : vector<128x128xbf16> to vector<128x128xf32>
    %c0_5 = arith.constant 0 : index
    %c0_6 = arith.constant 0 : index
    %5 = vector.load %arg4[%c0_5, %c0_6] : memref<128x128xbf16, #tpu.memory_space<vmem>>, vector<128x128xbf16>
    %6 = arith.extf %5 : vector<128x128xbf16> to vector<128x128xf32>
    %c0_7 = arith.constant 0 : index
    %c0_8 = arith.constant 0 : index
    %7 = vector.load %arg5[%c0_7, %c0_8] : memref<3x128xf32, #tpu.memory_space<vmem>>, vector<3x128xf32>
    %cst = arith.constant dense<0.000000e+00> : vector<16x128xf32>
    %8 = tpu.matmul %0, %2, %cst {dimension_numbers = #tpu.dot_dimension_numbers<[1], [0], [0], [1], [0, 0, 1, 1], [], []>} : vector<16x32xf32>, vector<32x128xf32>, vector<16x128xf32> -> vector<16x128xf32>
    %9 = vector.extract_strided_slice %7 {offsets = [0, 0], sizes = [1, 128], strides = [1, 1]} : vector<3x128xf32> to vector<1x128xf32>
    %10 = vector.broadcast %9 : vector<1x128xf32> to vector<16x128xf32>
    %11 = arith.addf %8, %10 : vector<16x128xf32>
    %cst_9 = arith.constant 0.000000e+00 : f32
    %12 = vector.broadcast %cst_9 : f32 to vector<16x128xf32>
    %13 = arith.maximumf %11, %12 : vector<16x128xf32>
    %cst_10 = arith.constant dense<0.000000e+00> : vector<16x128xf32>
    %14 = tpu.matmul %13, %4, %cst_10 {dimension_numbers = #tpu.dot_dimension_numbers<[1], [0], [0], [1], [0, 0, 1, 1], [], []>} : vector<16x128xf32>, vector<128x128xf32>, vector<16x128xf32> -> vector<16x128xf32>
    %15 = vector.extract_strided_slice %7 {offsets = [1, 0], sizes = [1, 128], strides = [1, 1]} : vector<3x128xf32> to vector<1x128xf32>
    %16 = vector.broadcast %15 : vector<1x128xf32> to vector<16x128xf32>
    %17 = arith.addf %14, %16 : vector<16x128xf32>
    %cst_11 = arith.constant 0.000000e+00 : f32
    %18 = vector.broadcast %cst_11 : f32 to vector<16x128xf32>
    %19 = arith.maximumf %17, %18 : vector<16x128xf32>
    %cst_12 = arith.constant dense<0.000000e+00> : vector<16x128xf32>
    %20 = tpu.matmul %19, %6, %cst_12 {dimension_numbers = #tpu.dot_dimension_numbers<[1], [0], [0], [1], [0, 0, 1, 1], [], []>} : vector<16x128xf32>, vector<128x128xf32>, vector<16x128xf32> -> vector<16x128xf32>
    %21 = vector.extract_strided_slice %7 {offsets = [2, 0], sizes = [1, 128], strides = [1, 1]} : vector<3x128xf32> to vector<1x128xf32>
    %22 = vector.broadcast %21 : vector<1x128xf32> to vector<16x128xf32>
    %23 = arith.addf %20, %22 : vector<16x128xf32>
    %c0_13 = arith.constant 0 : index
    %c0_14 = arith.constant 0 : index
    %24 = vector.load %arg6[%c0_13, %c0_14] : memref<16x128xf32, #tpu.memory_space<vmem>>, vector<16x128xf32>
    tpu.vector_store %arg6[%c0_13, %c0_14], %23 {strides = array<i32>} : memref<16x128xf32, #tpu.memory_space<vmem>>, vector<16x128xf32>,
    return
  }
  func.func @transform_0(%arg0: i32) -> (i32, i32) {
    %c0_i32 = arith.constant 0 : i32
    %c0_i32_0 = arith.constant 0 : i32
    return %arg0, %c0_i32 : i32, i32
  }
  func.func @transform_1(%arg0: i32) -> (i32, i32) {
    %c0_i32 = arith.constant 0 : i32
    %c0_i32_0 = arith.constant 0 : i32
    %c0_i32_1 = arith.constant 0 : i32
    return %c0_i32, %c0_i32_0 : i32, i32
  }
  func.func @transform_2(%arg0: i32) -> (i32, i32) {
    %c0_i32 = arith.constant 0 : i32
    %c0_i32_0 = arith.constant 0 : i32
    %c0_i32_1 = arith.constant 0 : i32
    return %c0_i32, %c0_i32_0 : i32, i32
  }
  func.func @transform_3(%arg0: i32) -> (i32, i32) {
    %c0_i32 = arith.constant 0 : i32
    %c0_i32_0 = arith.constant 0 : i32
    %c0_i32_1 = arith.constant 0 : i32
    return %c0_i32, %c0_i32_0 : i32, i32
  }
  func.func @transform_4(%arg0: i32) -> (i32, i32) {
    %c0_i32 = arith.constant 0 : i32
    %c0_i32_0 = arith.constant 0 : i32
    %c0_i32_1 = arith.constant 0 : i32
    return %c0_i32, %c0_i32_0 : i32, i32
  }
  func.func @transform_5(%arg0: i32) -> (i32, i32) {
    %c0_i32 = arith.constant 0 : i32
    %c0_i32_0 = arith.constant 0 : i32
    return %arg0, %c0_i32 : i32, i32
  }
}

</mosaic_0001>

<bundles_post_ra>
// kernel: discriminator_forward.1
= control target key start
LH: loop header
LB: loop body
LE: loop exit
PB: predicated region body
PF: predicated region fallthrough
CT: control target
= control target key end

     0   :  { %vm99_vm0 = vcmask 261120   ;;  %v95_v50 = vlaneseq  ;;  %s662_s1 = inlined_call_operand.vmem [shape: bf16[32,128], index: 1, kind: input, shape index: {}]   ;;  %s663_s0 = inlined_call_operand.vmem [shape: f32[16,32], index: 0, kind: input, shape index: {}]   ;;  %s664_s2 = inlined_call_operand.vmem [shape: bf16[128,128], index: 2, kind: input, shape index: {}]   ;;  %s665_s3 = inlined_call_operand.vmem [shape: bf16[128,128], index: 3, kind: input, shape index: {}]   ;;  %s666_s4 = inlined_call_operand.vmem [shape: f32[3,128], index: 4, kind: input, shape index: {}]   ;;  %s667_s5 = inlined_call_operand.vmem [shape: f32[16,128], index: 5, kind: output, shape index: {}]  }
   0x1   :  { %v352_v0 = vld [vmem:[%s662_s1] sm:$0xff]   ;;  %v423_v1 = vld [vmem:[%s662_s1 + $0x8] sm:$0xff]   ;;  %v430_v5 = vld [vmem:[%s664_s2 + $0x38] sm:$0xff]  }
   0x2   :  { %v20_v2 = vld [vmem:[%s663_s0] sm:$0xff]  ;;  %v357_v3 = vunpack.c.l.bf16 %v423_v1  ;;  %v358_v4 = vunpack.c.h.bf16 %v423_v1  ;;  %v429_v6 = vld [vmem:[%s664_s2 + $0x30] sm:$0xff]   ;;  %v389_v7 = vunpack.c.l.bf16 %v430_v5  ;;  %v390_v8 = vunpack.c.h.bf16 %v430_v5  ;;  %v428_v12 = vld [vmem:[%s664_s2 + $0x28] sm:$0xff]  }
   0x3   :  { %488 = vmatprep.mubr.msk.f32.mxu0 %vm99_vm0, %v20_v2  ;;  %v354_v9 = vunpack.c.h.bf16 %v352_v0  ;;  %v386_v10 = vunpack.c.h.bf16 %v429_v6  ;;  %v353_v11 = vunpack.c.l.bf16 %v352_v0  ;;  %v385_v13 = vunpack.c.l.bf16 %v429_v6  ;;  %v21_v14 = vld [vmem:[%s663_s0 + $0x8] sm:$0xff]  ;;  %v427_v16 = vld [vmem:[%s664_s2 + $0x20] sm:$0xff]   ;;  %v426_v19 = vld [vmem:[%s664_s2 + $0x18] sm:$0xff]  }
   0x4   :  { %480 = vmatprep.subr.mxu0 %v358_v4  ;;  %491 = vmatprep.subr.mxu1 %v390_v8  ;;  %v382_v15 = vunpack.c.h.bf16 %v428_v12  ;;  %v381_v17 = vunpack.c.l.bf16 %v428_v12  ;;  %v378_v18 = vunpack.c.h.bf16 %v427_v16  ;;  %v377_v20 = vunpack.c.l.bf16 %v427_v16  ;;  %v425_v22 = vld [vmem:[%s664_s2 + $0x10] sm:$0xff]   ;;  %v424_v26 = vld [vmem:[%s664_s2 + $0x8] sm:$0xff]   ;;  %v360_v29 = vld [vmem:[%s664_s2] sm:$0xff]  }
   0x5   :  { %481 = vmatpush3.msra.mxu0 %v358_v4  ;;  %492 = vmatpush3.msra.mxu1 %v390_v8  ;;  %v374_v21 = vunpack.c.h.bf16 %v426_v19  ;;  %v373_v23 = vunpack.c.l.bf16 %v426_v19  ;;  %v370_v24 = vunpack.c.h.bf16 %v425_v22  ;;  %v369_v25 = vunpack.c.l.bf16 %v425_v22  ;;  %v437_v32 = vld [vmem:[%s665_s3 + $0x38] sm:$0xff]   ;;  %v436_v33 = vld [vmem:[%s665_s3 + $0x30] sm:$0xff]   ;;  %v435_v37 = vld [vmem:[%s665_s3 + $0x28] sm:$0xff]  }
   0x6   :  { %482 = vmatprep.subr.mxu0 %v357_v3  ;;  %493 = vmatprep.subr.mxu1 %v389_v7  ;;  %v366_v27 = vunpack.c.h.bf16 %v424_v26  ;;  %v365_v28 = vunpack.c.l.bf16 %v424_v26  ;;  %v362_v30 = vunpack.c.h.bf16 %v360_v29  ;;  %v361_v31 = vunpack.c.l.bf16 %v360_v29  ;;  %v434_v40 = vld [vmem:[%s665_s3 + $0x20] sm:$0xff]   ;;  %v433_v43 = vld [vmem:[%s665_s3 + $0x18] sm:$0xff]   ;;  %v432_v46 = vld [vmem:[%s665_s3 + $0x10] sm:$0xff]  }
   0x7   :  { %483 = vmatpush3.msra.mxu0 %v357_v3  ;;  %494 = vmatpush3.msra.mxu1 %v389_v7  ;;  %v422_v34 = vunpack.c.h.bf16 %v437_v32  ;;  %v421_v35 = vunpack.c.l.bf16 %v437_v32  ;;  %v418_v36 = vunpack.c.h.bf16 %v436_v33  ;;  %v417_v38 = vunpack.c.l.bf16 %v436_v33  ;;  %v94_v53 = vld [vmem:[%s666_s4] sm:$0x7]  ;;  %v431_v61 = vld [vmem:[%s665_s3 + $0x8] sm:$0xff]  }
   0x8   :  { %484 = vmatprep.subr.mxu0 %v354_v9  ;;  %495 = vmatprep.subr.mxu1 %v386_v10  ;;  %v414_v39 = vunpack.c.h.bf16 %v435_v37  ;;  %v413_v41 = vunpack.c.l.bf16 %v435_v37  ;;  %v410_v42 = vunpack.c.h.bf16 %v434_v40  ;;  %v409_v44 = vunpack.c.l.bf16 %v434_v40  ;;  %v392_v0 = vld [vmem:[%s665_s3] sm:$0xff]  }
   0x9   :  { %485 = vmatpush3.msra.mxu0 %v354_v9  ;;  %496 = vmatpush3.msra.mxu1 %v386_v10  ;;  %v406_v45 = vunpack.c.h.bf16 %v433_v43  ;;  %v405_v47 = vunpack.c.l.bf16 %v433_v43  ;;  %v402_v48 = vunpack.c.h.bf16 %v432_v46  ;;  %v401_v49 = vunpack.c.l.bf16 %v432_v46 }
   0xa   :  { %486 = vmatprep.subr.mxu0 %v353_v11  ;;  %497 = vmatprep.subr.mxu1 %v385_v13  ;;  %v96_v51 = vshrl.u32 %v95_v50, 7  ;;  %v398_v62 = vunpack.c.h.bf16 %v431_v61  ;;  %v397_v63 = vunpack.c.l.bf16 %v431_v61  ;;  %v394_v1 = vunpack.c.h.bf16 %v392_v0 }
   0xb   :  { %487 = vmatpush3.msra.mxu0 %v353_v11  ;;  %498 = vmatpush3.msra.mxu1 %v385_v13  ;;  %v393_v2 = vunpack.c.l.bf16 %v392_v0 }
   0xc   :  { %489 = vmatmul.mubr.msk.f32.vlgmr.msra.gmra.mxu0 %vm99_vm0, %v21_v14  ;;  %499 = vmatprep.subr.mxu1 %v382_v15  ;;  %v97_v52 = vsub.s32 0, %v96_v51  ;;  %v185_v3 = vsub.s32 1, %v96_v51  ;;  %v266_v11 = vsub.s32 2, %v96_v51 }
   0xd   :  { %500 = vmatpush3.msra.mxu1 %v382_v15  ;;  %526 = vmatprep.subr.mxu0 %v422_v34 }
   0xe   :  { %501 = vmatprep.subr.mxu1 %v381_v17  ;;  %527 = vmatpush3.msra.mxu0 %v422_v34  ;;  %v98_v54 = vrot.slane %v94_v53, %v97_v52  ;;  %v186_v4 = vrot.slane %v94_v53, %v185_v3  ;;  %v267_v12 = vrot.slane %v94_v53, %v266_v11 }
   0xf   :  { %502 = vmatpush3.msra.mxu1 %v381_v17  ;;  %528 = vmatprep.subr.mxu0 %v421_v35 }
  0x10   :  { %503 = vmatprep.subr.mxu1 %v378_v18  ;;  %529 = vmatpush3.msra.mxu0 %v421_v35 }
  0x11   :  { %504 = vmatpush3.msra.mxu1 %v378_v18  ;;  %530 = vmatprep.subr.mxu0 %v418_v36 }
  0x12   :  { %505 = vmatprep.subr.mxu1 %v377_v20  ;;  %531 = vmatpush3.msra.mxu0 %v418_v36 }
  0x13   :  { %506 = vmatpush3.msra.mxu1 %v377_v20  ;;  %532 = vmatprep.subr.mxu0 %v417_v38 }
  0x14   :  { %507 = vmatprep.subr.mxu1 %v374_v21  ;;  %533 = vmatpush3.msra.mxu0 %v417_v38 }
  0x15   :  { %508 = vmatpush3.msra.mxu1 %v374_v21  ;;  %534 = vmatprep.subr.mxu0 %v414_v39 }
  0x16   :  { %509 = vmatprep.subr.mxu1 %v373_v23  ;;  %535 = vmatpush3.msra.mxu0 %v414_v39 }
  0x17   :  { %510 = vmatpush3.msra.mxu1 %v373_v23  ;;  %536 = vmatprep.subr.mxu0 %v413_v41 }
  0x18   :  { %511 = vmatprep.subr.mxu1 %v370_v24  ;;  %537 = vmatpush3.msra.mxu0 %v413_v41 }
  0x19   :  { %512 = vmatpush3.msra.mxu1 %v370_v24  ;;  %538 = vmatprep.subr.mxu0 %v410_v42 }
  0x1a   :  { %513 = vmatprep.subr.mxu1 %v369_v25  ;;  %539 = vmatpush3.msra.mxu0 %v410_v42 }
  0x1b   :  { %514 = vmatpush3.msra.mxu1 %v369_v25  ;;  %540 = vmatprep.subr.mxu0 %v409_v44 }
  0x1c   :  { %515 = vmatprep.subr.mxu1 %v366_v27  ;;  %541 = vmatpush3.msra.mxu0 %v409_v44 }
  0x1d   :  { %516 = vmatpush3.msra.mxu1 %v366_v27  ;;  %542 = vmatprep.subr.mxu0 %v406_v45 }
  0x1e   :  { %517 = vmatprep.subr.mxu1 %v365_v28  ;;  %543 = vmatpush3.msra.mxu0 %v406_v45 }
  0x1f   :  { %518 = vmatpush3.msra.mxu1 %v365_v28  ;;  %544 = vmatprep.subr.mxu0 %v405_v47 }
  0x20   :  { %519 = vmatprep.subr.mxu1 %v362_v30  ;;  %545 = vmatpush3.msra.mxu0 %v405_v47 }
  0x21   :  { %520 = vmatpush3.msra.mxu1 %v362_v30  ;;  %546 = vmatprep.subr.mxu0 %v402_v48 }
  0x22   :  { %521 = vmatprep.subr.mxu1 %v361_v31  ;;  %547 = vmatpush3.msra.mxu0 %v402_v48 }
  0x23   :  { %522 = vmatpush3.msra.mxu1 %v361_v31  ;;  %548 = vmatprep.subr.mxu0 %v401_v49 }
  0x24   :  { %549 = vmatpush3.msra.mxu0 %v401_v49 }
  0x25   :  { %550 = vmatprep.subr.mxu0 %v398_v62 }
  0x26   :  { %551 = vmatpush3.msra.mxu0 %v398_v62 }
  0x27   :  { %552 = vmatprep.subr.mxu0 %v397_v63 }
  0x28   :  { %553 = vmatpush3.msra.mxu0 %v397_v63 }
  0x29   :  { %554 = vmatprep.subr.mxu0 %v394_v1 }
  0x2a   :  { %555 = vmatpush3.msra.mxu0 %v394_v1 }
  0x2b   :  { %556 = vmatprep.subr.mxu0 %v393_v2 }
  0x2c   :  { %557 = vmatpush3.msra.mxu0 %v393_v2 }
  0xcc   :  { %v490_v55 = vpop.f32.mrf.mxu0 }
  0xcd   :  { %v178_v56 = vadd.f32 %v490_v55, %v98_v54 }
  0xce   :  { %v172_v57 = vpop.f32.mrf.mxu0 }
  0xcf   :  { %v173_v58 = vadd.f32 %v172_v57, %v98_v54  ;;  %v182_v60 = vmax.f32 %v178_v56, 0.0 }
  0xd1   :  { %v181_v59 = vmax.f32 %v173_v58, 0.0 }
  0xd3   :  { %523 = vmatprep.mubr.f32.mxu1 %v181_v59 }
  0xd4   :  { %524 = vmatmul.mubr.f32.vlgmr.msra.gmra.mxu1 %v182_v60 }
 0x194   :  { %v525_v5 = vpop.f32.mrf.mxu1 }
 0x195   :  { %v259_v6 = vadd.f32 %v525_v5, %v186_v4 }
 0x196   :  { %v253_v7 = vpop.f32.mrf.mxu1 }
 0x197   :  { %v254_v8 = vadd.f32 %v253_v7, %v186_v4  ;;  %v263_v10 = vmax.f32 %v259_v6, 0.0 }
 0x199   :  { %v262_v9 = vmax.f32 %v254_v8, 0.0 }
 0x19b   :  { %558 = vmatprep.mubr.f32.mxu0 %v262_v9 }
 0x19c   :  { %559 = vmatmul.mubr.f32.vlgmr.msra.gmra.mxu0 %v263_v10 }
 0x25c   :  { %v560_v13 = vpop.f32.mrf.mxu0 }
 0x25d   :  { %v340_v14 = vadd.f32 %v560_v13, %v267_v12 }
 0x25e   :  { %v334_v15 = vpop.f32.mrf.mxu0 }
 0x25f   :  { %344 = vst [vmem:[%s667_s5 + $0x8] sm:$0xff] %v340_v14  ;;  %v335_v16 = vadd.f32 %v334_v15, %v267_v12 }
 0x261   :  { %343 = vst [vmem:[%s667_s5] sm:$0xff] %v335_v16 }

</bundles_post_ra>
